<compile_context>
chip_gen: v5e
topology: v5e:2x2
jax: 0.10.0
libtpu: 0.0.40
codegen_flags: <defaults>
</compile_context>

<pallas_src>
import math
import functools

import jax
import jax.numpy as jnp
from jax.experimental import pallas as pl
from jax.experimental.pallas import tpu as pltpu

_LANE = 128  # vreg lane width: make matmul N dims / output stores lane-dense.


def _round_up(n, m):
    return ((n + m - 1) // m) * m


def _mlp_kernel(*refs, out_scale, has_u):
    if has_u:
        (x_ref, u_ref, w1x_ref, w1u_ref, b1_ref,
         w2_ref, b2_ref, w3_ref, b3_ref, o_ref) = refs
        # layer 1 on the un-concatenated inputs: x@W1x + u@W1u + b1
        z1 = jnp.dot(x_ref[...], w1x_ref[...], preferred_element_type=jnp.float32)
        z1 = z1 + jnp.dot(u_ref[...], w1u_ref[...],
                          preferred_element_type=jnp.float32)
    else:
        (x_ref, w1_ref, b1_ref, w2_ref, b2_ref, w3_ref, b3_ref, o_ref) = refs
        z1 = jnp.dot(x_ref[...], w1_ref[...], preferred_element_type=jnp.float32)

    h = jnp.tanh(z1 + b1_ref[...])
    h = jnp.tanh(jnp.dot(h, w2_ref[...], preferred_element_type=jnp.float32)
                 + b2_ref[...])
    z3 = (jnp.dot(h, w3_ref[...], preferred_element_type=jnp.float32)
          + b3_ref[...])
    o_ref[...] = (out_scale * jax.nn.sigmoid(z3)).astype(o_ref.dtype)


def mlp_forward(x, params, *, out_scale=1.0, u=None, block_b=512):
    """Fused MLP forward as one Pallas TPU kernel, tiled over batch.

    x: (B, in_x) f32; u: optional (B, in_u) f32 (handled via split W1, no concat).
    params: w1 (in, h1), b1 (1, h1), w2 (h1, h2), b2 (1, h2), w3 (h2, out),
            b3 (1, out), all stored as (in_features, out_features).
    """
    w1, b1 = params["w1"], params["b1"]
    w2, b2 = params["w2"], params["b2"]
    w3, b3 = params["w3"], params["b3"]

    B = x.shape[0]
    out_size = w3.shape[1]

    # --- lane-dense padding of the matmul N dims (zeros -> math unchanged) ---
    h1p = _round_up(w1.shape[1], _LANE)
    h2p = _round_up(w2.shape[1], _LANE)
    outp = _round_up(out_size, _LANE)

    def pad_cols(a, n):
        return a if a.shape[1] == n else jnp.pad(a, ((0, 0), (0, n - a.shape[1])))

    def pad_rows(a, n):
        return a if a.shape[0] == n else jnp.pad(a, ((0, n - a.shape[0]), (0, 0)))

    w1p = pad_cols(w1, h1p)
    b1p = pad_cols(b1, h1p)
    w2p = pad_cols(pad_rows(w2, h1p), h2p)   # padded W2 rows are zero
    b2p = pad_cols(b2, h2p)
    w3p = pad_cols(pad_rows(w3, h2p), outp)  # padded W3 rows are zero
    b3p = pad_cols(b3, outp)

    has_u = u is not None
    if has_u:
        in_x = x.shape[1]
        w1x, w1u = w1p[:in_x], w1p[in_x:]    # row-split of W1, no concat of x/u

    # --- batch tiling: TB rows per grid step (multiple of 8, or full B) ---
    TB = block_b if B > block_b else B
    grid = (pl.cdiv(B, TB),)

    kernel = functools.partial(_mlp_kernel, out_scale=float(out_scale),
                               has_u=has_u)

    def batch_spec(feat):
        return pl.BlockSpec((TB, feat), lambda i: (i, 0))

    def resident_spec(shape):
        # Same block for every grid step -> stays resident in VMEM.
        return pl.BlockSpec(shape, lambda i: (0, 0))

    if has_u:
        operands = (x, u, w1x, w1u, b1p, w2p, b2p, w3p, b3p)
        in_specs = [
            batch_spec(x.shape[1]), batch_spec(u.shape[1]),
            resident_spec(w1x.shape), resident_spec(w1u.shape),
            resident_spec(b1p.shape), resident_spec(w2p.shape),
            resident_spec(b2p.shape), resident_spec(w3p.shape),
            resident_spec(b3p.shape),
        ]
    else:
        operands = (x, w1p, b1p, w2p, b2p, w3p, b3p)
        in_specs = [
            batch_spec(x.shape[1]),
            resident_spec(w1p.shape), resident_spec(b1p.shape),
            resident_spec(w2p.shape), resident_spec(b2p.shape),
            resident_spec(w3p.shape), resident_spec(b3p.shape),
        ]

    out_padded = pl.pallas_call(
        kernel,
        out_shape=jax.ShapeDtypeStruct((B, outp), jnp.float32),
        grid=grid,
        in_specs=in_specs,
        out_specs=pl.BlockSpec((TB, outp), lambda i: (i, 0)),
        compiler_params=pltpu.CompilerParams(
            # batch tiles are independent -> shard across v7x's 2 TensorCores
            dimension_semantics=("parallel",),
            # usage is ~2 MiB at TB=512; 32 MiB fits v5e/v6e/v7x scoped VMEM
            vmem_limit_bytes=32 * 1024 * 1024,
        ),
    )(*operands)

    # Only the logical output columns are meaningful (padded lanes hold
    # out_scale * sigmoid(0)); slice them off.
    return out_padded[:, :out_size]


def init_mlp_params(key, in_size, h1, h2, out_size):
    """nn.Linear default init (U[-1/sqrt(fan_in), 1/sqrt(fan_in)]) plus the
    module's l3.weight *= 0.1 and l3.bias = 0."""
    ks = jax.random.split(key, 6)

    def linear_init(kw, kb, fan_in, fan_out):
        bound = 1.0 / math.sqrt(fan_in)
        w = jax.random.uniform(kw, (fan_in, fan_out), jnp.float32,
                               minval=-bound, maxval=bound)
        b = jax.random.uniform(kb, (1, fan_out), jnp.float32,
                               minval=-bound, maxval=bound)
        return w, b

    w1, b1 = linear_init(ks[0], ks[1], in_size, h1)
    w2, b2 = linear_init(ks[2], ks[3], h1, h2)
    w3, b3 = linear_init(ks[4], ks[5], h2, out_size)
    w3 = w3 * 0.1          # self.l3.weight.data.mul_(0.1)
    b3 = b3 * 0.0          # self.l3.bias.data.mul_(0.0)
    return {"w1": w1, "b1": b1, "w2": w2, "b2": b2, "w3": w3, "b3": b3}


def mlp_reference(x, params, *, out_scale=1.0, u=None):
    """Pure-JAX reference for correctness checking."""
    if u is not None:
        x = jnp.concatenate([x, u], axis=1)
    h = jnp.tanh(x @ params["w1"] + params["b1"])
    h = jnp.tanh(h @ params["w2"] + params["b2"])
    return out_scale * jax.nn.sigmoid(h @ params["w3"] + params["b3"])


if __name__ == "__main__":
    key = jax.random.PRNGKey(0)
    k_param, k_x, k_u, k_x2, k_u2 = jax.random.split(key, 5)

    # state x: (batch, 8), action u: (batch, 4) -> in_size = 12
    batch, x_dim, u_dim = 8, 8, 4
    in_size, h1, h2, out_size = x_dim + u_dim, 32, 32, 4
    out_scale = 2.0

    params = init_mlp_params(k_param, in_size, h1, h2, out_size)

    # --- check 1: small batch, x+u path (single grid step) ---
    x = jax.random.normal(k_x, (batch, x_dim), jnp.float32)
    u = jax.random.normal(k_u, (batch, u_dim), jnp.float32)
    out = jax.block_until_ready(mlp_forward(x, params, out_scale=out_scale, u=u))
    ref = mlp_reference(x, params, out_scale=out_scale, u=u)
    assert out.shape == (batch, out_size)
    assert jnp.allclose(out, ref, atol=1e-5, rtol=1e-5), "mismatch (x,u) path"

    # --- check 2: multi-tile batch grid (grid > 1, batch pipelined) ---
    B2 = 64
    x2 = jax.random.normal(k_x2, (B2, x_dim), jnp.float32)
    u2 = jax.random.normal(k_u2, (B2, u_dim), jnp.float32)
    out2 = jax.block_until_ready(
        mlp_forward(x2, params, out_scale=out_scale, u=u2, block_b=16))
    ref2 = mlp_reference(x2, params, out_scale=out_scale, u=u2)
    assert jnp.allclose(out2, ref2, atol=1e-5, rtol=1e-5), "mismatch tiled path"

    # --- check 3: u=None path (single-input layer 1) ---
    params_nou = init_mlp_params(k_param, x_dim, h1, h2, out_size)
    out3 = jax.block_until_ready(
        mlp_forward(x, params_nou, out_scale=out_scale))
    ref3 = mlp_reference(x, params_nou, out_scale=out_scale)
    assert jnp.allclose(out3, ref3, atol=1e-5, rtol=1e-5), "mismatch u=None path"

    print("KERNEL_OK")
</pallas_src>

<mosaic_0001>
module attributes {stable_mosaic.version = 11 : i64} {
  func.func @_mlp_kernel(%arg0: i32, %arg1: memref<8x8xf32, #tpu.memory_space<vmem>>, %arg2: memref<8x4xf32, #tpu.memory_space<vmem>>, %arg3: memref<8x128xf32, #tpu.memory_space<vmem>>, %arg4: memref<4x128xf32, #tpu.memory_space<vmem>>, %arg5: memref<1x128xf32, #tpu.memory_space<vmem>>, %arg6: memref<128x128xf32, #tpu.memory_space<vmem>>, %arg7: memref<1x128xf32, #tpu.memory_space<vmem>>, %arg8: memref<128x128xf32, #tpu.memory_space<vmem>>, %arg9: memref<1x128xf32, #tpu.memory_space<vmem>>, %arg10: memref<8x128xf32, #tpu.memory_space<vmem>>) attributes {dimension_semantics = [#tpu.dimension_semantics<parallel>], iteration_bounds = array<i64: 1>, scalar_prefetch = 0 : i64, scratch_operands = 0 : i64, tpu.core_type = #tpu.core_type<tc>, window_params = [{transform_indices = @transform_0, window_bounds = array<i64: 8, 8>}, {transform_indices = @transform_1, window_bounds = array<i64: 8, 4>}, {pipeline_mode = #tpu.pipeline_mode<synchronous>, transform_indices = @transform_2, window_bounds = array<i64: 8, 128>}, {pipeline_mode = #tpu.pipeline_mode<synchronous>, transform_indices = @transform_3, window_bounds = array<i64: 4, 128>}, {pipeline_mode = #tpu.pipeline_mode<synchronous>, transform_indices = @transform_4, window_bounds = array<i64: 1, 128>}, {pipeline_mode = #tpu.pipeline_mode<synchronous>, transform_indices = @transform_5, window_bounds = array<i64: 128, 128>}, {pipeline_mode = #tpu.pipeline_mode<synchronous>, transform_indices = @transform_6, window_bounds = array<i64: 1, 128>}, {pipeline_mode = #tpu.pipeline_mode<synchronous>, transform_indices = @transform_7, window_bounds = array<i64: 128, 128>}, {pipeline_mode = #tpu.pipeline_mode<synchronous>, transform_indices = @transform_8, window_bounds = array<i64: 1, 128>}, {transform_indices = @transform_9, window_bounds = array<i64: 8, 128>}]} {
    %c0 = arith.constant 0 : index
    %c0_0 = arith.constant 0 : index
    %0 = vector.load %arg1[%c0, %c0_0] : memref<8x8xf32, #tpu.memory_space<vmem>>, vector<8x8xf32>
    %c0_1 = arith.constant 0 : index
    %c0_2 = arith.constant 0 : index
    %1 = vector.load %arg3[%c0_1, %c0_2] : memref<8x128xf32, #tpu.memory_space<vmem>>, vector<8x128xf32>
    %cst = arith.constant dense<0.000000e+00> : vector<8x128xf32>
    %2 = tpu.matmul %0, %1, %cst {dimension_numbers = #tpu.dot_dimension_numbers<[1], [0], [0], [1], [0, 0, 1, 1], [], []>} : vector<8x8xf32>, vector<8x128xf32>, vector<8x128xf32> -> vector<8x128xf32>
    %c0_3 = arith.constant 0 : index
    %c0_4 = arith.constant 0 : index
    %3 = vector.load %arg2[%c0_3, %c0_4] : memref<8x4xf32, #tpu.memory_space<vmem>>, vector<8x4xf32>
    %c0_5 = arith.constant 0 : index
    %c0_6 = arith.constant 0 : index
    %4 = vector.load %arg4[%c0_5, %c0_6] : memref<4x128xf32, #tpu.memory_space<vmem>>, vector<4x128xf32>
    %cst_7 = arith.constant dense<0.000000e+00> : vector<8x128xf32>
    %5 = tpu.matmul %3, %4, %cst_7 {dimension_numbers = #tpu.dot_dimension_numbers<[1], [0], [0], [1], [0, 0, 1, 1], [], []>} : vector<8x4xf32>, vector<4x128xf32>, vector<8x128xf32> -> vector<8x128xf32>
    %6 = arith.addf %2, %5 : vector<8x128xf32>
    %c0_8 = arith.constant 0 : index
    %c0_9 = arith.constant 0 : index
    %7 = vector.load %arg5[%c0_8, %c0_9] : memref<1x128xf32, #tpu.memory_space<vmem>>, vector<1x128xf32>
    %8 = vector.broadcast %7 : vector<1x128xf32> to vector<8x128xf32>
    %9 = arith.addf %6, %8 : vector<8x128xf32>
    %10 = math.tanh %9 : vector<8x128xf32>
    %c0_10 = arith.constant 0 : index
    %c0_11 = arith.constant 0 : index
    %11 = vector.load %arg6[%c0_10, %c0_11] : memref<128x128xf32, #tpu.memory_space<vmem>>, vector<128x128xf32>
    %cst_12 = arith.constant dense<0.000000e+00> : vector<8x128xf32>
    %12 = tpu.matmul %10, %11, %cst_12 {dimension_numbers = #tpu.dot_dimension_numbers<[1], [0], [0], [1], [0, 0, 1, 1], [], []>} : vector<8x128xf32>, vector<128x128xf32>, vector<8x128xf32> -> vector<8x128xf32>
    %c0_13 = arith.constant 0 : index
    %c0_14 = arith.constant 0 : index
    %13 = vector.load %arg7[%c0_13, %c0_14] : memref<1x128xf32, #tpu.memory_space<vmem>>, vector<1x128xf32>
    %14 = vector.broadcast %13 : vector<1x128xf32> to vector<8x128xf32>
    %15 = arith.addf %12, %14 : vector<8x128xf32>
    %16 = math.tanh %15 : vector<8x128xf32>
    %c0_15 = arith.constant 0 : index
    %c0_16 = arith.constant 0 : index
    %17 = vector.load %arg8[%c0_15, %c0_16] : memref<128x128xf32, #tpu.memory_space<vmem>>, vector<128x128xf32>
    %cst_17 = arith.constant dense<0.000000e+00> : vector<8x128xf32>
    %18 = tpu.matmul %16, %17, %cst_17 {dimension_numbers = #tpu.dot_dimension_numbers<[1], [0], [0], [1], [0, 0, 1, 1], [], []>} : vector<8x128xf32>, vector<128x128xf32>, vector<8x128xf32> -> vector<8x128xf32>
    %c0_18 = arith.constant 0 : index
    %c0_19 = arith.constant 0 : index
    %19 = vector.load %arg9[%c0_18, %c0_19] : memref<1x128xf32, #tpu.memory_space<vmem>>, vector<1x128xf32>
    %20 = vector.broadcast %19 : vector<1x128xf32> to vector<8x128xf32>
    %21 = arith.addf %18, %20 : vector<8x128xf32>
    %22 = arith.negf %21 : vector<8x128xf32>
    %23 = math.exp %22 : vector<8x128xf32>
    %cst_20 = arith.constant 1.000000e+00 : f32
    %24 = vector.broadcast %cst_20 : f32 to vector<8x128xf32>
    %25 = arith.addf %24, %23 : vector<8x128xf32>
    %26 = arith.divf %24, %25 : vector<8x128xf32>
    %cst_21 = arith.constant 2.000000e+00 : f32
    %27 = vector.broadcast %cst_21 : f32 to vector<8x128xf32>
    %28 = arith.mulf %27, %26 : vector<8x128xf32>
    %c0_22 = arith.constant 0 : index
    %c0_23 = arith.constant 0 : index
    %29 = vector.load %arg10[%c0_22, %c0_23] : memref<8x128xf32, #tpu.memory_space<vmem>>, vector<8x128xf32>
    tpu.vector_store %arg10[%c0_22, %c0_23], %28 {strides = array<i32>} : memref<8x128xf32, #tpu.memory_space<vmem>>, vector<8x128xf32>,
    return
  }
  func.func @transform_0(%arg0: i32) -> (i32, i32) {
    %c0_i32 = arith.constant 0 : i32
    %c0_i32_0 = arith.constant 0 : i32
    return %arg0, %c0_i32 : i32, i32
  }
  func.func @transform_1(%arg0: i32) -> (i32, i32) {
    %c0_i32 = arith.constant 0 : i32
    %c0_i32_0 = arith.constant 0 : i32
    return %arg0, %c0_i32 : i32, i32
  }
  func.func @transform_2(%arg0: i32) -> (i32, i32) {
    %c0_i32 = arith.constant 0 : i32
    %c0_i32_0 = arith.constant 0 : i32
    %c0_i32_1 = arith.constant 0 : i32
    return %c0_i32, %c0_i32_0 : i32, i32
  }
  func.func @transform_3(%arg0: i32) -> (i32, i32) {
    %c0_i32 = arith.constant 0 : i32
    %c0_i32_0 = arith.constant 0 : i32
    %c0_i32_1 = arith.constant 0 : i32
    return %c0_i32, %c0_i32_0 : i32, i32
  }
  func.func @transform_4(%arg0: i32) -> (i32, i32) {
    %c0_i32 = arith.constant 0 : i32
    %c0_i32_0 = arith.constant 0 : i32
    %c0_i32_1 = arith.constant 0 : i32
    return %c0_i32, %c0_i32_0 : i32, i32
  }
  func.func @transform_5(%arg0: i32) -> (i32, i32) {
    %c0_i32 = arith.constant 0 : i32
    %c0_i32_0 = arith.constant 0 : i32
    %c0_i32_1 = arith.constant 0 : i32
    return %c0_i32, %c0_i32_0 : i32, i32
  }
  func.func @transform_6(%arg0: i32) -> (i32, i32) {
    %c0_i32 = arith.constant 0 : i32
    %c0_i32_0 = arith.constant 0 : i32
    %c0_i32_1 = arith.constant 0 : i32
    return %c0_i32, %c0_i32_0 : i32, i32
  }
  func.func @transform_7(%arg0: i32) -> (i32, i32) {
    %c0_i32 = arith.constant 0 : i32
    %c0_i32_0 = arith.constant 0 : i32
    %c0_i32_1 = arith.constant 0 : i32
    return %c0_i32, %c0_i32_0 : i32, i32
  }
  func.func @transform_8(%arg0: i32) -> (i32, i32) {
    %c0_i32 = arith.constant 0 : i32
    %c0_i32_0 = arith.constant 0 : i32
    %c0_i32_1 = arith.constant 0 : i32
    return %c0_i32, %c0_i32_0 : i32, i32
  }
  func.func @transform_9(%arg0: i32) -> (i32, i32) {
    %c0_i32 = arith.constant 0 : i32
    %c0_i32_0 = arith.constant 0 : i32
    return %arg0, %c0_i32 : i32, i32
  }
}

</mosaic_0001>

<bundles_post_ra>
// kernel: tpu_custom_call.1
= control target key start
LH: loop header
LB: loop body
LE: loop exit
PB: predicated region body
PF: predicated region fallthrough
CT: control target
= control target key end

     0   :  { %14 = vsyncpa [#allocation3], 0  ;;  %s469_s0 = inlined_call_operand.vmem [shape: f32[8,8], index: 0, kind: input, shape index: {}]   ;;  %s470_s1 = inlined_call_operand.vmem [shape: f32[8,4], index: 1, kind: input, shape index: {}]   ;;  %s471_s2 = inlined_call_operand.hbm [shape: f32[8,128], index: 2, kind: input, shape index: {}]   ;;  %s472_s3 = inlined_call_operand.vmem [shape: f32[4,128], index: 3, kind: input, shape index: {}]   ;;  %s473_s4 = inlined_call_operand.vmem [shape: f32[1,128], index: 4, kind: input, shape index: {}]   ;;  %s474_s5 = inlined_call_operand.hbm [shape: f32[128,128], index: 5, kind: input, shape index: {}]   ;;  %s475_s6 = inlined_call_operand.vmem [shape: f32[1,128], index: 6, kind: input, shape index: {}]   ;;  %s476_s7 = inlined_call_operand.hbm [shape: f32[128,128], index: 7, kind: input, shape index: {}]   ;;  %s477_s8 = inlined_call_operand.vmem [shape: f32[1,128], index: 8, kind: input, shape index: {}]   ;;  %s478_s9 = inlined_call_operand.hbm [shape: f32[8,128], index: 9, kind: output, shape index: {}]  }
   0x1   :  { %15 = vsyncpa [#allocation6], 0  ;;  %s40_s11 = sshll.u32 %s474_s5, 4  ;;  %s41_s11 = int_to_ptr.hbm [resolvable:$true] %s40_s11 }
   0x2   :  { %16 = vsyncpa [#allocation4], 0  ;;  %s383_s12 = smov [#allocation5]   ;;  %s26_s16 = sshll.u32 %s471_s2, 4  ;;  %s27_s16 = int_to_ptr.hbm [resolvable:$true] %s26_s16 }
   0x3   :  { %s42_s13 = sshll.u32 %s383_s12, 4  ;;  %s384_s17 = smov 128   ;;  %s43_s13 = int_to_ptr.vmem [resolvable:$true] %s42_s13 }
   0x4   :  { %s385_s18 = smov 8   ;;  %s386_s19 = smov [#allocation2]  }
   0x5   :  { %48 = dma.hbm_to_vmem [thread:$0]  %s41_s11, 2048, %s43_s13, [#allocation6], %s384_s17, %s384_s17, %s385_s18  }
   0x6   :  { %s28_s20 = sshll.u32 %s386_s19, 4  ;;  %s55_s23 = sshll.u32 %s476_s7, 4  ;;  %s29_s20 = int_to_ptr.vmem [resolvable:$true] %s28_s20  ;;  %s56_s23 = int_to_ptr.hbm [resolvable:$true] %s55_s23 }
   0x7   :  { %31 = dma.hbm_to_vmem [thread:$0]  %s27_s16, 128, %s29_s20, [#allocation3]  }
   0x8   :  { %s387_s5 = smov [#allocation7]  }
   0x9   :  { %s57_s24 = sshll.u32 %s387_s5, 4  ;;  %s58_s24 = int_to_ptr.vmem [resolvable:$true] %s57_s24 }
   0xa   :  { %63 = dma.hbm_to_vmem [thread:$0]  %s56_s23, 2048, %s58_s24, [#allocation6], %s384_s17, %s384_s17, %s385_s18  }
   0xb   :  { %377 = dma.done.wait [#allocation3], 128  }
   0xc   :  { %378 = vsyncadd [#allocation3], 4294967168 }
   0xd   :  { %379 = dma.done.wait [#allocation6], 4096  }
   0xe   :  { %380 = vsyncadd [#allocation6], 4294963200  ;;  %vm86_vm0 = vcmask 1043456   ;;  %vm82_vm1 = vcmask 31744   ;;  %vm110_vm2 = vcmask 64512   ;;  %v79_v1 = vld [vmem:[#allocation2] sm:$0xff] }
   0xf   :  { %v81_v0 = vld [vmem:[%s472_s3] sm:$0xf]  ;;  %129 = vmatpush.msra.mxu1 %v79_v1  ;;  %v154_v5 = vld [vmem:[#allocation5 + $0x70] sm:$0xff]  ;;  %v153_v6 = vld [vmem:[#allocation5 + $0x68] sm:$0xff]  ;;  %s249_s12 = sshll.u32 %s478_s9, 4  ;;  %s250_s12 = int_to_ptr.hbm [resolvable:$true] %s249_s12 }
  0x10   :  { %v80_v2 = vld [vmem:[%s470_s1] sm:$0xff]  ;;  %260 = vmatpush.msk.msra.mxu0 %vm86_vm0, %v81_v0  ;;  %v152_v7 = vld [vmem:[#allocation5 + $0x60] sm:$0xff]  ;;  %v150_v9 = vld [vmem:[#allocation5 + $0x50] sm:$0xff] }
  0x11   :  { %v78_v3 = vld [vmem:[%s469_s0] sm:$0xff]  ;;  %261 = vmatmul.msk.f32.vlgmr.msra.gmra.mxu0 %vm82_vm1, %v80_v2  ;;  %v149_v10 = vld [vmem:[#allocation5 + $0x48] sm:$0xff]  ;;  %v148_v11 = vld [vmem:[#allocation5 + $0x40] sm:$0xff] }
  0x12   :  { %v155_v4 = vld [vmem:[#allocation5 + $0x78] sm:$0xff]  ;;  %262 = vmatmul.msk.f32.vlgmr.msra.gmra.mxu1 %vm110_vm2, %v78_v3  ;;  %v146_v13 = vld [vmem:[#allocation5 + $0x30] sm:$0xff]  ;;  %v145_v14 = vld [vmem:[#allocation5 + $0x28] sm:$0xff] }
  0x13   :  { %160 = vmatpush.msra.mxu2 %v155_v4  ;;  %v151_v8 = vld [vmem:[#allocation5 + $0x58] sm:$0xff]  ;;  %v144_v15 = vld [vmem:[#allocation5 + $0x20] sm:$0xff]  ;;  %v142_v17 = vld [vmem:[#allocation5 + $0x10] sm:$0xff] }
  0x14   :  { %v147_v12 = vld [vmem:[#allocation5 + $0x38] sm:$0xff]  ;;  %v141_v18 = vld [vmem:[#allocation5 + $0x8] sm:$0xff]  ;;  %v140_v19 = vld [vmem:[#allocation5] sm:$0xff] }
  0x15   :  { %161 = vmatpush.msra.mxu2 %v154_v5  ;;  %v143_v16 = vld [vmem:[#allocation5 + $0x18] sm:$0xff]  ;;  %v195_v21 = vld [vmem:[#allocation7 + $0x70] sm:$0xff]  ;;  %v194_v22 = vld [vmem:[#allocation7 + $0x68] sm:$0xff] }
  0x16   :  { %v196_v20 = vld [vmem:[#allocation7 + $0x78] sm:$0xff]  ;;  %v193_v23 = vld [vmem:[#allocation7 + $0x60] sm:$0xff]  ;;  %v191_v25 = vld [vmem:[#allocation7 + $0x50] sm:$0xff] }
  0x17   :  { %162 = vmatpush.msra.mxu2 %v153_v6  ;;  %201 = vmatpush.msra.mxu3 %v196_v20  ;;  %v192_v24 = vld [vmem:[#allocation7 + $0x58] sm:$0xff]  ;;  %v190_v26 = vld [vmem:[#allocation7 + $0x48] sm:$0xff]  ;;  %v189_v27 = vld [vmem:[#allocation7 + $0x40] sm:$0xff] }
  0x18   :  { %v188_v28 = vld [vmem:[#allocation7 + $0x38] sm:$0xff]  ;;  %v187_v29 = vld [vmem:[#allocation7 + $0x30] sm:$0xff]  ;;  %v186_v30 = vld [vmem:[#allocation7 + $0x28] sm:$0xff] }
  0x19   :  { %163 = vmatpush.msra.mxu2 %v152_v7  ;;  %202 = vmatpush.msra.mxu3 %v195_v21  ;;  %v270_v31 = vld [vmem:[%s473_s4] ss:$0 sm:$0xff]  ;;  %v185_v37 = vld [vmem:[#allocation7 + $0x20] sm:$0xff]  ;;  %v183_v39 = vld [vmem:[#allocation7 + $0x10] sm:$0xff] }
  0x1a   :  { %v184_v38 = vld [vmem:[#allocation7 + $0x18] sm:$0xff]  ;;  %v182_v40 = vld [vmem:[#allocation7 + $0x8] sm:$0xff]  ;;  %v181_v41 = vld [vmem:[#allocation7] sm:$0xff] }
  0x1b   :  { %164 = vmatpush.msra.mxu2 %v151_v8  ;;  %203 = vmatpush.msra.mxu3 %v194_v22  ;;  %v271_v42 = vld [vmem:[%s475_s6] ss:$0 sm:$0xff]  ;;  %s388_s6 = smov [#allocation8]  }
  0x1c   :  { %v272_v46 = vld [vmem:[%s477_s8] ss:$0 sm:$0xff]  ;;  %s247_s8 = sshll.u32 %s388_s6, 4  ;;  %s248_s8 = int_to_ptr.vmem [resolvable:$true] %s247_s8 }
  0x1d   :  { %165 = vmatpush.msra.mxu2 %v150_v9  ;;  %204 = vmatpush.msra.mxu3 %v193_v23 }
  0x1f   :  { %166 = vmatpush.msra.mxu2 %v149_v10  ;;  %205 = vmatpush.msra.mxu3 %v192_v24 }
  0x21   :  { %167 = vmatpush.msra.mxu2 %v148_v11  ;;  %206 = vmatpush.msra.mxu3 %v191_v25 }
  0x23   :  { %168 = vmatpush.msra.mxu2 %v147_v12  ;;  %207 = vmatpush.msra.mxu3 %v190_v26 }
  0x25   :  { %169 = vmatpush.msra.mxu2 %v146_v13  ;;  %208 = vmatpush.msra.mxu3 %v189_v27 }
  0x27   :  { %170 = vmatpush.msra.mxu2 %v145_v14  ;;  %209 = vmatpush.msra.mxu3 %v188_v28 }
  0x29   :  { %171 = vmatpush.msra.mxu2 %v144_v15  ;;  %210 = vmatpush.msra.mxu3 %v187_v29 }
  0x2b   :  { %172 = vmatpush.msra.mxu2 %v143_v16  ;;  %211 = vmatpush.msra.mxu3 %v186_v30 }
  0x2d   :  { %173 = vmatpush.msra.mxu2 %v142_v17  ;;  %212 = vmatpush.msra.mxu3 %v185_v37 }
  0x2f   :  { %174 = vmatpush.msra.mxu2 %v141_v18  ;;  %213 = vmatpush.msra.mxu3 %v184_v38 }
  0x31   :  { %175 = vmatpush.msra.mxu2 %v140_v19  ;;  %214 = vmatpush.msra.mxu3 %v183_v39 }
  0x33   :  { %215 = vmatpush.msra.mxu3 %v182_v40 }
  0x35   :  { %216 = vmatpush.msra.mxu3 %v181_v41 }
  0x8e   :  { %v107_v32 = vpop.f32.mrf.mxu0 }
  0x8f   :  { %v131_v33 = vpop.f32.mrf.mxu1 }
  0x90   :  { %v132_v34 = vadd.f32 %v131_v33, %v107_v32 }
  0x92   :  { %v138_v35 = vadd.f32 %v270_v31, %v132_v34 }
  0x94   :  { %273 = vtanh.f32 %v138_v35 }
  0x9a   :  { %v274_v36 = vpop.eup %273 }
  0x9b   :  { %176 = vmatmul.f32.vlgmr.msra.gmra.mxu2 %v274_v36 }
 0x11e   :  { %v177_v43 = vpop.f32.mrf.mxu2 }
 0x11f   :  { %v178_v44 = vadd.f32 %v271_v42, %v177_v43 }
 0x121   :  { %275 = vtanh.f32 %v178_v44 }
 0x127   :  { %v276_v45 = vpop.eup %275 }
 0x128   :  { %217 = vmatmul.f32.vlgmr.msra.gmra.mxu3 %v276_v45 }
 0x1ab   :  { %v218_v47 = vpop.f32.mrf.mxu3 }
 0x1ac   :  { %v219_v48 = vadd.f32 %v272_v46, %v218_v47 }
 0x1ae   :  { %v263_v49 = vmul.f32 -1.442695, %v219_v48 }
 0x1b0   :  { %277 = vpow2.f32 %v263_v49 }
 0x1b6   :  { %v278_v50 = vpop.eup %277 }
 0x1b7   :  { %v224_v51 = vadd.f32 1.0, %v278_v50 }
 0x1b9   :  { %279 = vrcp.f32 %v224_v51  ;;  %v236_v55 = vand.u32 2147483648, %v224_v51  ;;  %v234_v57 = vand.u32 2147483647, %v224_v51  ;;  %vm230_vm4 = vweird.f32 %v224_v51 }
 0x1bb   :  { %v237_v59 = vor.u32 1.1754944e-38, %v236_v55  ;;  %vm235_vm6 = vcmp.eq.f32.partialorder %v234_v57, 8.507059e+37 }
 0x1bf   :  { %v280_v52 = vpop.eup %279 }
 0x1c0   :  { %v226_v53 = vmul.f32 %v280_v52, %v224_v51  ;;  %vm231_vm3 = vweird.f32 %v280_v52 }
 0x1c1   :  { %vm232_vm5 = vmor %vm230_vm4, %vm231_vm3 }
 0x1c2   :  { %v227_v54 = vsub.f32 1.0, %v226_v53 }
 0x1c4   :  { %v228_v56 = vmul.f32 %v280_v52, %v227_v54 }
 0x1c6   :  { %v229_v58 = vadd.f32 %v280_v52, %v228_v56 }
 0x1c8   :  { %v233_v60 = vsel %vm232_vm5, %v280_v52, %v229_v58 }
 0x1c9   :  { %v238_v61 = vsel %vm235_vm6, %v237_v59, %v233_v60 }
 0x1ca   :  { %v240_v62 = vmul.f32 2.0, %v238_v61 }
 0x1cc   :  { %241 = vst [vmem:[#allocation8] sm:$0xff] %v240_v62 }
 0x1cd   :  { %252 = dma.vmem_to_hbm [thread:$0]  %s248_s8, 128, %s250_s12, [#allocation4]  }
 0x1ce   :  { %381 = dma.done.wait [#allocation4], 128  }
 0x1cf   :  { %382 = vsyncadd [#allocation4], 4294967168 }
 0x1d0   :  { %257 = vsyncpa [#allocation3], 1 }
 0x1d1   :  { %258 = vsyncpa [#allocation6], 1 }
 0x1d2   :  { %259 = vsyncpa [#allocation4], 1 }

</bundles_post_ra>
